<compile_context>
chip_gen: v6e
topology: v6e:2x2x1
jax: 0.10.0
libtpu: 0.0.40
codegen_flags: <defaults>
</compile_context>

<pallas_src>
import functools

import jax
import jax.numpy as jnp
from jax.experimental import pallas as pl
from jax.experimental.pallas import tpu as pltpu


def _round_up(v, m):
    return (v + m - 1) // m * m


def _round_down(v, m):
    return max(m, v // m * m)


# ---------------------------------------------------------------------------
# Kernels
# ---------------------------------------------------------------------------

def _ffn_kernel_resident(x_ref, w1_ref, b1_ref, w2_ref, b2_ref, o_ref):
    """Whole FFN for one row tile; W1/W2 are VMEM-resident (constant index_map)."""
    h = jnp.dot(x_ref[...], w1_ref[...], preferred_element_type=jnp.float32)
    h = jnp.maximum(h + b1_ref[...], 0.0)
    y = jnp.dot(h.astype(w2_ref.dtype), w2_ref[...],
                preferred_element_type=jnp.float32)
    o_ref[...] = (y + b2_ref[...]).astype(o_ref.dtype)


def _ffn_kernel_htiled(x_ref, w1_ref, b1_ref, w2_ref, b2_ref, o_ref):
    """One (row-tile, H-slab) step; accumulates into the resident f32 o_ref."""
    h_step = pl.program_id(1)
    h = jnp.dot(x_ref[...], w1_ref[...], preferred_element_type=jnp.float32)
    h = jnp.maximum(h + b1_ref[...], 0.0)
    part = jnp.dot(h.astype(w2_ref.dtype), w2_ref[...],
                   preferred_element_type=jnp.float32)

    @pl.when(h_step == 0)
    def _():
        o_ref[...] = part + b2_ref[...]          # b2 added exactly once

    @pl.when(h_step > 0)
    def _():
        o_ref[...] += part


# ---------------------------------------------------------------------------
# Planning / one-time parameter prep
# ---------------------------------------------------------------------------

def _vmem_limit_bytes():
    cap = 64 * 1024 * 1024                        # conservative default (v7x)
    try:
        cap = int(pltpu.get_tpu_info().vmem_capacity_bytes)
    except Exception:
        pass
    # ~3/4 of physical VMEM: 48 MiB on v7x (64 MiB), ~96 MiB on v5e/v6e (128 MiB).
    return min((cap * 3) // 4, 100 * 1024 * 1024)


def _weight_plan(D_in, H, D_out, vmem_limit):
    """Decide resident vs. H-tiled weights and feature-dim padding."""
    D_in_p = _round_up(D_in, 128)
    D_out_p = _round_up(D_out, 128)
    H_p = _round_up(H, 128)
    w_bytes = (D_in_p * H_p + H_p * D_out_p) * 2          # bf16, one copy
    # Resident fast path if (conservatively double-buffered) weights fit in half the cap.
    if 2 * w_bytes <= vmem_limit // 2:
        return dict(resident=True, D_in_p=D_in_p, H_p=H_p, D_out_p=D_out_p,
                    tile_h=None)
    # Fallback: stream W1/W2 as H-slabs. tile_h multiple of 256 (full MXU pass on
    # v6e/v7x); shrink tile_h (never the row/output matmul dims) to fit VMEM.
    # Note: if profiling shows exposed weight-slab DMA on v5e, pipeline_mode=
    # pl.Buffered(3) on the w1/w2 specs is the knob to turn.
    tile_h = 512

    def slab_bytes(th, nominal_tm=256):
        return (2 * D_in_p * th * 2 + 2 * th * D_out_p * 2   # weight slabs (2 bufs)
                + 2 * nominal_tm * D_in_p * 2                # x tile
                + 2 * nominal_tm * D_out_p * 4               # f32 out tile
                + nominal_tm * th * 6                        # h (f32 + bf16 cast)
                + 2 * (th + D_out_p) * 4)                    # biases

    while slab_bytes(tile_h) > vmem_limit and tile_h > 256:
        tile_h = max(256, tile_h // 2)
    return dict(resident=False, D_in_p=D_in_p, H_p=_round_up(H, tile_h),
                D_out_p=D_out_p, tile_h=tile_h)


def prepare_ffn_params(w1, b1, w2, b2):
    """One-time pad + bf16 cast of FFN parameters (hoisted out of the per-call path)."""
    D_in, H = w1.shape
    D_out = w2.shape[1]
    vmem_limit = _vmem_limit_bytes()
    plan = _weight_plan(D_in, H, D_out, vmem_limit)
    plan.update(D_in=D_in, H=H, D_out=D_out, vmem_limit=vmem_limit)
    D_in_p, H_p, D_out_p = plan["D_in_p"], plan["H_p"], plan["D_out_p"]

    w1_p = jnp.pad(w1.astype(jnp.bfloat16), ((0, D_in_p - D_in), (0, H_p - H)))
    w2_p = jnp.pad(w2.astype(jnp.bfloat16), ((0, H_p - H), (0, D_out_p - D_out)))
    b1_p = jnp.pad(b1.astype(jnp.float32), (0, H_p - H)).reshape(1, H_p)
    b2_p = jnp.pad(b2.astype(jnp.float32), (0, D_out_p - D_out)).reshape(1, D_out_p)
    return dict(plan=plan, w1=w1_p, b1=b1_p, w2=w2_p, b2=b2_p)


# ---------------------------------------------------------------------------
# pallas_call wrapper
# ---------------------------------------------------------------------------

def _ffn_call(x, w1_p, b1_p, w2_p, b2_p, *, plan, tile_m_req=512):
    orig_dtype = x.dtype
    *lead, D_in = x.shape
    assert D_in == plan["D_in"], "x feature dim does not match prepared params"
    M = 1
    for d in lead:
        M *= d

    D_in_p, H_p, D_out_p = plan["D_in_p"], plan["H_p"], plan["D_out_p"]
    H, D_out = plan["H"], plan["D_out"]
    vmem_limit = plan["vmem_limit"]
    resident = plan["resident"]
    tile_h = plan["tile_h"]

    final_dtype = orig_dtype if jnp.issubdtype(orig_dtype, jnp.floating) else jnp.float32
    # Resident path: whole reduction inside one invocation -> emit final dtype
    # directly (bf16 x -> bf16 out halves writeback). Tiled path: must stay f32
    # because we accumulate into o_ref across the H axis.
    out_dtype = final_dtype if resident else jnp.float32
    out_itemsize = jnp.dtype(out_dtype).itemsize

    # ---- row-tile selection: multiple of 16 (bf16 sublane pack), prefer 256
    # multiples (full MXU pass); guarantee >=2 row tiles when M is large so the
    # "parallel" rows axis shards across v7x's 2 TensorCores.
    M_ceil = _round_up(max(M, 1), 16)
    tile_m = min(tile_m_req, M_ceil)
    if M_ceil >= 512:
        tile_m = min(tile_m, _round_up(pl.cdiv(M_ceil, 2), 256))
    tile_m = _round_up(tile_m, 256) if tile_m >= 256 else _round_up(tile_m, 16)

    if resident:
        w_vmem = 2 * (D_in_p * H_p + H_p * D_out_p) * 2      # 2 bufs (conservative)

        def vmem_bytes(tm):
            return (w_vmem
                    + 2 * (H_p + D_out_p) * 4                # biases
                    + 2 * tm * D_in_p * 2                    # x tile (bf16)
                    + 2 * tm * D_out_p * out_itemsize        # out tile
                    + tm * H_p * 6)                          # h f32 + bf16 cast
    else:
        def vmem_bytes(tm):
            return (2 * tm * D_in_p * 2                      # x tile
                    + 2 * D_in_p * tile_h * 2                # w1 slab
                    + 2 * tile_h * D_out_p * 2               # w2 slab
                    + 2 * (tile_h + D_out_p) * 4             # biases
                    + 2 * tm * D_out_p * 4                   # f32 out tile (accumulator)
                    + tm * tile_h * 6)                       # h f32 + bf16 cast

    # tile_h was already fixed by the weight plan; only shrink tile_m here and
    # only as a last resort, preserving x16 alignment.
    while vmem_bytes(tile_m) > vmem_limit and tile_m > 16:
        tile_m = _round_down(tile_m // 2, 16)

    M_p = _round_up(M, tile_m)
    n_row_tiles = M_p // tile_m

    # ---- x: cast/pad only when actually needed (skip extra HBM passes otherwise).
    x2d = x.reshape(M, D_in)
    if x2d.dtype != jnp.bfloat16:
        x2d = x2d.astype(jnp.bfloat16)
    if (M_p, D_in_p) != (M, D_in):
        x2d = jnp.pad(x2d, ((0, M_p - M), (0, D_in_p - D_in)))

    w_hbm_bytes = (w1_p.size + w2_p.size) * 2
    cost = pl.CostEstimate(
        flops=2 * M * (D_in * H + H * D_out),
        transcendentals=0,
        bytes_accessed=(x2d.size * 2
                        + (w_hbm_bytes if resident else n_row_tiles * w_hbm_bytes)
                        + b1_p.size * 4 + b2_p.size * 4
                        + M_p * D_out_p * out_itemsize),
    )

    if resident:
        grid = (n_row_tiles,)
        in_specs = [
            pl.BlockSpec((tile_m, D_in_p), lambda i: (i, 0)),     # x rows
            pl.BlockSpec((D_in_p, H_p), lambda i: (0, 0)),        # W1 (resident)
            pl.BlockSpec((1, H_p), lambda i: (0, 0)),             # b1
            pl.BlockSpec((H_p, D_out_p), lambda i: (0, 0)),       # W2 (resident)
            pl.BlockSpec((1, D_out_p), lambda i: (0, 0)),         # b2
        ]
        out_spec = pl.BlockSpec((tile_m, D_out_p), lambda i: (i, 0))
        kernel = _ffn_kernel_resident
        dims_sem = ("parallel",)
    else:
        grid = (n_row_tiles, H_p // tile_h)
        in_specs = [
            pl.BlockSpec((tile_m, D_in_p), lambda i, h: (i, 0)),   # x rows
            pl.BlockSpec((D_in_p, tile_h), lambda i, h: (0, h)),   # W1 slab
            pl.BlockSpec((1, tile_h), lambda i, h: (0, h)),        # b1 slab
            pl.BlockSpec((tile_h, D_out_p), lambda i, h: (h, 0)),  # W2 slab
            pl.BlockSpec((1, D_out_p), lambda i, h: (0, 0)),       # b2
        ]
        out_spec = pl.BlockSpec((tile_m, D_out_p), lambda i, h: (i, 0))
        kernel = _ffn_kernel_htiled
        dims_sem = ("parallel", "arbitrary")

    out2d = pl.pallas_call(
        kernel,
        out_shape=jax.ShapeDtypeStruct((M_p, D_out_p), out_dtype),
        grid_spec=pltpu.PrefetchScalarGridSpec(
            num_scalar_prefetch=0,
            grid=grid,
            in_specs=in_specs,
            out_specs=out_spec,
        ),
        compiler_params=pltpu.CompilerParams(
            dimension_semantics=dims_sem,
            vmem_limit_bytes=vmem_limit,
        ),
        cost_estimate=cost,
    )(x2d, w1_p, b1_p, w2_p, b2_p)

    out = out2d[:M, :D_out].astype(final_dtype)
    return out.reshape(*lead, D_out)


def make_position_wise_ffn(w1, b1, w2, b2, *, tile_m=512):
    """One-time parameter prep + a jitted x -> FFN(x) callable (weight prep hoisted)."""
    params = prepare_ffn_params(w1, b1, w2, b2)
    fn = functools.partial(_ffn_call,
                           w1_p=params["w1"], b1_p=params["b1"],
                           w2_p=params["w2"], b2_p=params["b2"],
                           plan=params["plan"], tile_m_req=tile_m)
    return jax.jit(fn)


def position_wise_ffn(x, w1, b1, w2, b2, *, tile_m=512):
    """Convenience single-shot API (prefer make_position_wise_ffn to hoist the prep)."""
    params = prepare_ffn_params(w1, b1, w2, b2)
    return _ffn_call(x, params["w1"], params["b1"], params["w2"], params["b2"],
                     plan=params["plan"], tile_m_req=tile_m)


def _ffn_reference_bf16(x, w1, b1, w2, b2):
    """Plain-JAX reference with the same bf16-inputs / f32-accumulate numerics."""
    h = jnp.dot(x.astype(jnp.bfloat16), w1.astype(jnp.bfloat16),
                preferred_element_type=jnp.float32) + b1
    h = jnp.maximum(h, 0.0)
    y = jnp.dot(h.astype(jnp.bfloat16), w2.astype(jnp.bfloat16),
                preferred_element_type=jnp.float32) + b2
    return y


if __name__ == "__main__":
    # Shapes match the module spec: X = torch.ones((2, 100, 24)), hidden=32, out=24.
    B, S = 2, 100
    ffn_num_input, ffn_num_hiddens, ffn_num_outputs = 24, 32, 24

    key = jax.random.PRNGKey(0)
    kx, k1, k2, k3, k4 = jax.random.split(key, 5)

    x = jax.random.normal(kx, (B, S, ffn_num_input), dtype=jnp.float32)
    # deterministic synthetic parameters (stored as (in, out) = nn.Linear.weight.T)
    w1 = jax.random.normal(k1, (ffn_num_input, ffn_num_hiddens), jnp.float32) * 0.1
    b1 = jax.random.normal(k2, (ffn_num_hiddens,), jnp.float32) * 0.1
    w2 = jax.random.normal(k3, (ffn_num_hiddens, ffn_num_outputs), jnp.float32) * 0.1
    b2 = jax.random.normal(k4, (ffn_num_outputs,), jnp.float32) * 0.1

    ffn = make_position_wise_ffn(w1, b1, w2, b2)   # one-time pad/cast, hoisted
    out = jax.block_until_ready(ffn(x))

    ref = _ffn_reference_bf16(x, w1, b1, w2, b2)
    assert out.shape == (B, S, ffn_num_outputs)
    max_err = float(jnp.max(jnp.abs(out - ref)))
    assert jnp.allclose(out, ref, atol=5e-3, rtol=5e-3), max_err

    print("KERNEL_OK")
</pallas_src>

<mosaic_0001>
module attributes {stable_mosaic.version = 11 : i64} {
  func.func @_ffn_kernel_resident(%arg0: i32, %arg1: memref<208x128xbf16, #tpu.memory_space<vmem>>, %arg2: memref<128x128xbf16, #tpu.memory_space<vmem>>, %arg3: memref<1x128xf32, #tpu.memory_space<vmem>>, %arg4: memref<128x128xbf16, #tpu.memory_space<vmem>>, %arg5: memref<1x128xf32, #tpu.memory_space<vmem>>, %arg6: memref<208x128xf32, #tpu.memory_space<vmem>>) attributes {dimension_semantics = [#tpu.dimension_semantics<parallel>], iteration_bounds = array<i64: 1>, scalar_prefetch = 0 : i64, scratch_operands = 0 : i64, tpu.core_type = #tpu.core_type<tc>, window_params = [{transform_indices = @transform_0, window_bounds = array<i64: 208, 128>}, {pipeline_mode = #tpu.pipeline_mode<synchronous>, transform_indices = @transform_1, window_bounds = array<i64: 128, 128>}, {pipeline_mode = #tpu.pipeline_mode<synchronous>, transform_indices = @transform_2, window_bounds = array<i64: 1, 128>}, {pipeline_mode = #tpu.pipeline_mode<synchronous>, transform_indices = @transform_3, window_bounds = array<i64: 128, 128>}, {pipeline_mode = #tpu.pipeline_mode<synchronous>, transform_indices = @transform_4, window_bounds = array<i64: 1, 128>}, {transform_indices = @transform_5, window_bounds = array<i64: 208, 128>}]} {
    %c0 = arith.constant 0 : index
    %c0_0 = arith.constant 0 : index
    %0 = vector.load %arg1[%c0, %c0_0] : memref<208x128xbf16, #tpu.memory_space<vmem>>, vector<208x128xbf16>
    %c0_1 = arith.constant 0 : index
    %c0_2 = arith.constant 0 : index
    %1 = vector.load %arg2[%c0_1, %c0_2] : memref<128x128xbf16, #tpu.memory_space<vmem>>, vector<128x128xbf16>
    %cst = arith.constant dense<0.000000e+00> : vector<208x128xf32>
    %2 = tpu.matmul %0, %1, %cst {dimension_numbers = #tpu.dot_dimension_numbers<[1], [0], [0], [1], [0, 0, 1, 1], [], []>} : vector<208x128xbf16>, vector<128x128xbf16>, vector<208x128xf32> -> vector<208x128xf32>
    %c0_3 = arith.constant 0 : index
    %c0_4 = arith.constant 0 : index
    %3 = vector.load %arg3[%c0_3, %c0_4] : memref<1x128xf32, #tpu.memory_space<vmem>>, vector<1x128xf32>
    %4 = vector.broadcast %3 : vector<1x128xf32> to vector<208x128xf32>
    %5 = arith.addf %2, %4 : vector<208x128xf32>
    %cst_5 = arith.constant 0.000000e+00 : f32
    %6 = vector.broadcast %cst_5 : f32 to vector<208x128xf32>
    %7 = arith.maximumf %5, %6 : vector<208x128xf32>
    %8 = arith.truncf %7 : vector<208x128xf32> to vector<208x128xbf16>
    %c0_6 = arith.constant 0 : index
    %c0_7 = arith.constant 0 : index
    %9 = vector.load %arg4[%c0_6, %c0_7] : memref<128x128xbf16, #tpu.memory_space<vmem>>, vector<128x128xbf16>
    %cst_8 = arith.constant dense<0.000000e+00> : vector<208x128xf32>
    %10 = tpu.matmul %8, %9, %cst_8 {dimension_numbers = #tpu.dot_dimension_numbers<[1], [0], [0], [1], [0, 0, 1, 1], [], []>} : vector<208x128xbf16>, vector<128x128xbf16>, vector<208x128xf32> -> vector<208x128xf32>
    %c0_9 = arith.constant 0 : index
    %c0_10 = arith.constant 0 : index
    %11 = vector.load %arg5[%c0_9, %c0_10] : memref<1x128xf32, #tpu.memory_space<vmem>>, vector<1x128xf32>
    %12 = vector.broadcast %11 : vector<1x128xf32> to vector<208x128xf32>
    %13 = arith.addf %10, %12 : vector<208x128xf32>
    %c0_11 = arith.constant 0 : index
    %c0_12 = arith.constant 0 : index
    %14 = vector.load %arg6[%c0_11, %c0_12] : memref<208x128xf32, #tpu.memory_space<vmem>>, vector<208x128xf32>
    tpu.vector_store %arg6[%c0_11, %c0_12], %13 {strides = array<i32>} : memref<208x128xf32, #tpu.memory_space<vmem>>, vector<208x128xf32>,
    return
  }
  func.func @transform_0(%arg0: i32) -> (i32, i32) {
    %c0_i32 = arith.constant 0 : i32
    %c0_i32_0 = arith.constant 0 : i32
    return %arg0, %c0_i32 : i32, i32
  }
  func.func @transform_1(%arg0: i32) -> (i32, i32) {
    %c0_i32 = arith.constant 0 : i32
    %c0_i32_0 = arith.constant 0 : i32
    %c0_i32_1 = arith.constant 0 : i32
    return %c0_i32, %c0_i32_0 : i32, i32
  }
  func.func @transform_2(%arg0: i32) -> (i32, i32) {
    %c0_i32 = arith.constant 0 : i32
    %c0_i32_0 = arith.constant 0 : i32
    %c0_i32_1 = arith.constant 0 : i32
    return %c0_i32, %c0_i32_0 : i32, i32
  }
  func.func @transform_3(%arg0: i32) -> (i32, i32) {
    %c0_i32 = arith.constant 0 : i32
    %c0_i32_0 = arith.constant 0 : i32
    %c0_i32_1 = arith.constant 0 : i32
    return %c0_i32, %c0_i32_0 : i32, i32
  }
  func.func @transform_4(%arg0: i32) -> (i32, i32) {
    %c0_i32 = arith.constant 0 : i32
    %c0_i32_0 = arith.constant 0 : i32
    %c0_i32_1 = arith.constant 0 : i32
    return %c0_i32, %c0_i32_0 : i32, i32
  }
  func.func @transform_5(%arg0: i32) -> (i32, i32) {
    %c0_i32 = arith.constant 0 : i32
    %c0_i32_0 = arith.constant 0 : i32
    return %arg0, %c0_i32 : i32, i32
  }
}

</mosaic_0001>

<bundles_post_ra>
// kernel: _ffn_call.1
= control target key start
LH: loop header
LB: loop body
LE: loop exit
PB: predicated region body
PF: predicated region fallthrough
CT: control target
= control target key end

     0   :  { %v850_v0 = vmov 0.0   ;;  %vm851_vm0 = vmmov 0   ;;  %s1177_s1 = inlined_call_operand.vmem [shape: bf16[128,128], index: 1, kind: input, shape index: {}]   ;;  %s1178_s0 = inlined_call_operand.vmem [shape: bf16[208,128], index: 0, kind: input, shape index: {}]   ;;  %s1179_s3 = inlined_call_operand.vmem [shape: bf16[128,128], index: 3, kind: input, shape index: {}]   ;;  %s1180_s2 = inlined_call_operand.vmem [shape: f32[1,128], index: 2, kind: input, shape index: {}]   ;;  %s1181_s4 = inlined_call_operand.vmem [shape: f32[1,128], index: 4, kind: input, shape index: {}]   ;;  %s1182_s5 = inlined_call_operand.vmem [shape: f32[208,128], index: 5, kind: output, shape index: {}]  }
   0x1   :  { %683 = vmatprep.subr.bf16.mxu0 %v850_v0  ;;  %v821_v1 = vld [vmem:[%s1177_s1 + $0x38] sm:$0xff]   ;;  %699 = vmatprep.mubr.msk.bf16.mxu0 %vm851_vm0, %v850_v0  ;;  %v822_v2 = vld [vmem:[%s1177_s1 + $0x30] sm:$0xff]   ;;  %v823_v3 = vld [vmem:[%s1177_s1 + $0x28] sm:$0xff]  }
   0x2   :  { %751 = vmatprep.subr.bf16.mxu1 %v850_v0  ;;  %767 = vmatprep.mubr.msk.bf16.mxu1 %vm851_vm0, %v850_v0  ;;  %v824_v4 = vld [vmem:[%s1177_s1 + $0x20] sm:$0xff]   ;;  %v825_v5 = vld [vmem:[%s1177_s1 + $0x18] sm:$0xff]   ;;  %v826_v6 = vld [vmem:[%s1177_s1 + $0x10] sm:$0xff]  }
   0x3   :  { %684 = vmatpush3.bf16.msra.mxu0 %v821_v1  ;;  %v842_v7 = vld [vmem:[%s1179_s3 + $0x38] sm:$0xff]   ;;  %v827_v8 = vld [vmem:[%s1177_s1 + $0x8] sm:$0xff]   ;;  %v843_v9 = vld [vmem:[%s1179_s3 + $0x30] sm:$0xff]  }
   0x4   :  { %685 = vmatprep.subr.bf16.mxu0 %v850_v0  ;;  %752 = vmatpush3.bf16.msra.mxu1 %v842_v7  ;;  %v828_v10 = vld [vmem:[%s1177_s1] sm:$0xff]   ;;  %v844_v11 = vld [vmem:[%s1179_s3 + $0x28] sm:$0xff]   ;;  %v846_v14 = vld [vmem:[%s1179_s3 + $0x18] sm:$0xff]  }
   0x5   :  { %753 = vmatprep.subr.bf16.mxu1 %v850_v0  ;;  %v829_v12 = vld [vmem:[%s1178_s0] sm:$0xff]   ;;  %v830_v15 = vld [vmem:[%s1178_s0 + $0x8] sm:$0xff]   ;;  %v831_v16 = vld [vmem:[%s1178_s0 + $0x10] sm:$0xff]  }
   0x6   :  { %v845_v13 = vld [vmem:[%s1179_s3 + $0x20] sm:$0xff]   ;;  %v832_v17 = vld [vmem:[%s1178_s0 + $0x18] sm:$0xff]   ;;  %v834_v19 = vld [vmem:[%s1178_s0 + $0x28] sm:$0xff]  }
   0x7   :  { %686 = vmatpush3.bf16.msra.mxu0 %v822_v2  ;;  %v833_v18 = vld [vmem:[%s1178_s0 + $0x20] sm:$0xff]   ;;  %v835_v20 = vld [vmem:[%s1178_s0 + $0x30] sm:$0xff]   ;;  %v836_v21 = vld [vmem:[%s1178_s0 + $0x38] sm:$0xff]  }
   0x8   :  { %687 = vmatprep.subr.bf16.mxu0 %v850_v0  ;;  %754 = vmatpush3.bf16.msra.mxu1 %v843_v9  ;;  %v837_v22 = vld [vmem:[%s1178_s0 + $0x40] sm:$0xff]   ;;  %v847_v23 = vld [vmem:[%s1179_s3 + $0x10] sm:$0xff]   ;;  %v848_v24 = vld [vmem:[%s1179_s3 + $0x8] sm:$0xff]  }
   0x9   :  { %755 = vmatprep.subr.bf16.mxu1 %v850_v0  ;;  %v838_v25 = vld [vmem:[%s1178_s0 + $0x48] sm:$0xff]   ;;  %v849_v26 = vld [vmem:[%s1179_s3] sm:$0xff]   ;;  %v839_v27 = vld [vmem:[%s1178_s0 + $0x50] sm:$0xff]  }
   0xa   :  { %v840_v28 = vld [vmem:[%s1178_s0 + $0x58] sm:$0xff]   ;;  %v841_v29 = vld [vmem:[%s1178_s0 + $0x60] sm:$0xff]  }
   0xb   :  { %688 = vmatpush3.bf16.msra.mxu0 %v823_v3  ;;  %v1016_v30 = vld [vmem:[%s1180_s2] ss:$0 sm:$0xff] }
   0xc   :  { %689 = vmatprep.subr.bf16.mxu0 %v850_v0  ;;  %756 = vmatpush3.bf16.msra.mxu1 %v844_v11 }
   0xd   :  { %757 = vmatprep.subr.bf16.mxu1 %v850_v0 }
   0xf   :  { %690 = vmatpush3.bf16.msra.mxu0 %v824_v4 }
  0x10   :  { %691 = vmatprep.subr.bf16.mxu0 %v850_v0  ;;  %758 = vmatpush3.bf16.msra.mxu1 %v845_v13 }
  0x11   :  { %759 = vmatprep.subr.bf16.mxu1 %v850_v0 }
  0x13   :  { %692 = vmatpush3.bf16.msra.mxu0 %v825_v5 }
  0x14   :  { %693 = vmatprep.subr.bf16.mxu0 %v850_v0  ;;  %760 = vmatpush3.bf16.msra.mxu1 %v846_v14 }
  0x15   :  { %761 = vmatprep.subr.bf16.mxu1 %v850_v0 }
  0x17   :  { %694 = vmatpush3.bf16.msra.mxu0 %v826_v6 }
  0x18   :  { %695 = vmatprep.subr.bf16.mxu0 %v850_v0  ;;  %762 = vmatpush3.bf16.msra.mxu1 %v847_v23 }
  0x19   :  { %763 = vmatprep.subr.bf16.mxu1 %v850_v0 }
  0x1b   :  { %696 = vmatpush3.bf16.msra.mxu0 %v827_v8 }
  0x1c   :  { %697 = vmatprep.subr.bf16.mxu0 %v850_v0  ;;  %764 = vmatpush3.bf16.msra.mxu1 %v848_v24 }
  0x1d   :  { %765 = vmatprep.subr.bf16.mxu1 %v850_v0 }
  0x1f   :  { %698 = vmatpush3.bf16.msra.mxu0 %v828_v10 }
  0x20   :  { %766 = vmatpush3.bf16.msra.mxu1 %v849_v26 }
  0x22   :  { %700 = vmatmul.mubr.bf16.vlgmr.msra.gmra.mxu0 %v829_v12 }
  0x23   :  { %703 = vmatprep.mubr.msk.bf16.mxu0 %vm851_vm0, %v850_v0 }
  0x2a   :  { %704 = vmatmul.mubr.bf16.gmra.mxu0 %v830_v15 }
  0x2b   :  { %707 = vmatprep.mubr.msk.bf16.mxu0 %vm851_vm0, %v850_v0 }
  0x32   :  { %708 = vmatmul.mubr.bf16.gmra.mxu0 %v831_v16 }
  0x33   :  { %711 = vmatprep.mubr.msk.bf16.mxu0 %vm851_vm0, %v850_v0 }
  0x3a   :  { %712 = vmatmul.mubr.bf16.gmra.mxu0 %v832_v17 }
  0x3b   :  { %715 = vmatprep.mubr.msk.bf16.mxu0 %vm851_vm0, %v850_v0 }
  0x42   :  { %716 = vmatmul.mubr.bf16.gmra.mxu0 %v833_v18 }
  0x43   :  { %719 = vmatprep.mubr.msk.bf16.mxu0 %vm851_vm0, %v850_v0 }
  0x4a   :  { %720 = vmatmul.mubr.bf16.gmra.mxu0 %v834_v19 }
  0x4b   :  { %723 = vmatprep.mubr.msk.bf16.mxu0 %vm851_vm0, %v850_v0 }
  0x52   :  { %724 = vmatmul.mubr.bf16.gmra.mxu0 %v835_v20 }
  0x53   :  { %727 = vmatprep.mubr.msk.bf16.mxu0 %vm851_vm0, %v850_v0 }
  0x5a   :  { %728 = vmatmul.mubr.bf16.gmra.mxu0 %v836_v21 }
  0x5b   :  { %731 = vmatprep.mubr.msk.bf16.mxu0 %vm851_vm0, %v850_v0 }
  0x62   :  { %732 = vmatmul.mubr.bf16.gmra.mxu0 %v837_v22 }
  0x63   :  { %735 = vmatprep.mubr.msk.bf16.mxu0 %vm851_vm0, %v850_v0 }
  0x6a   :  { %736 = vmatmul.mubr.bf16.gmra.mxu0 %v838_v25 }
  0x6b   :  { %739 = vmatprep.mubr.msk.bf16.mxu0 %vm851_vm0, %v850_v0 }
  0x72   :  { %740 = vmatmul.mubr.bf16.gmra.mxu0 %v839_v27 }
  0x73   :  { %743 = vmatprep.mubr.msk.bf16.mxu0 %vm851_vm0, %v850_v0 }
  0x7a   :  { %744 = vmatmul.mubr.bf16.gmra.mxu0 %v840_v28 }
  0x7b   :  { %747 = vmatprep.mubr.msk.bf16.mxu0 %vm851_vm0, %v850_v0 }
  0x82   :  { %748 = vmatmul.mubr.bf16.gmra.mxu0 %v841_v29 }
  0xe2   :  { %v230_v31 = vpop.f32.mrf.mxu0 }
  0xe3   :  { %v231_v33 = vadd.f32 %v1016_v30, %v230_v31 }
  0xe4   :  { %v701_v32 = vpop.f32.mrf.mxu0 }
  0xe5   :  { %v333_v37 = vmax.f32 %v231_v33, 0.0 }
  0xe6   :  { %v233_v34 = vpop.f32.mrf.mxu0 }
  0xe7   :  { %v234_v35 = vadd.f32 %v1016_v30, %v233_v34 }
  0xe8   :  { %v702_v36 = vpop.f32.mrf.mxu0 }
  0xe9   :  { %v334_v38 = vmax.f32 %v234_v35, 0.0 }
  0xea   :  { %v238_v39 = vpop.f32.mrf.mxu0 }
  0xeb   :  { %v359_v40 = vpack.c.bf16 %v334_v38, %v333_v37  ;;  %v239_v42 = vadd.f32 %v1016_v30, %v238_v39 }
  0xec   :  { %v705_v41 = vpop.f32.mrf.mxu0 }
  0xed   :  { %768 = vmatmul.mubr.bf16.vlgmr.msra.gmra.mxu1 %v359_v40  ;;  %v335_v46 = vmax.f32 %v239_v42, 0.0 }
  0xee   :  { %v241_v43 = vpop.f32.mrf.mxu0  ;;  %771 = vmatprep.mubr.msk.bf16.mxu1 %vm851_vm0, %v850_v0 }
  0xef   :  { %v242_v44 = vadd.f32 %v1016_v30, %v241_v43 }
  0xf0   :  { %v706_v45 = vpop.f32.mrf.mxu0 }
  0xf1   :  { %v336_v47 = vmax.f32 %v242_v44, 0.0 }
  0xf2   :  { %v246_v48 = vpop.f32.mrf.mxu0 }
  0xf3   :  { %v360_v49 = vpack.c.bf16 %v336_v47, %v335_v46  ;;  %v247_v51 = vadd.f32 %v1016_v30, %v246_v48 }
  0xf4   :  { %v709_v50 = vpop.f32.mrf.mxu0 }
  0xf5   :  { %772 = vmatmul.mubr.bf16.gmra.mxu1 %v360_v49  ;;  %v337_v55 = vmax.f32 %v247_v51, 0.0 }
  0xf6   :  { %v249_v52 = vpop.f32.mrf.mxu0  ;;  %775 = vmatprep.mubr.msk.bf16.mxu1 %vm851_vm0, %v850_v0 }
  0xf7   :  { %v250_v53 = vadd.f32 %v1016_v30, %v249_v52 }
  0xf8   :  { %v710_v54 = vpop.f32.mrf.mxu0 }
  0xf9   :  { %v338_v56 = vmax.f32 %v250_v53, 0.0 }
  0xfa   :  { %v254_v57 = vpop.f32.mrf.mxu0 }
  0xfb   :  { %v361_v58 = vpack.c.bf16 %v338_v56, %v337_v55  ;;  %v255_v60 = vadd.f32 %v1016_v30, %v254_v57 }
  0xfc   :  { %v713_v59 = vpop.f32.mrf.mxu0 }
  0xfd   :  { %776 = vmatmul.mubr.bf16.gmra.mxu1 %v361_v58  ;;  %v339_v1 = vmax.f32 %v255_v60, 0.0 }
  0xfe   :  { %v257_v61 = vpop.f32.mrf.mxu0  ;;  %779 = vmatprep.mubr.msk.bf16.mxu1 %vm851_vm0, %v850_v0 }
  0xff   :  { %v258_v62 = vadd.f32 %v1016_v30, %v257_v61 }
 0x100   :  { %v714_v63 = vpop.f32.mrf.mxu0 }
 0x101   :  { %v340_v2 = vmax.f32 %v258_v62, 0.0 }
 0x102   :  { %v262_v3 = vpop.f32.mrf.mxu0 }
 0x103   :  { %v362_v4 = vpack.c.bf16 %v340_v2, %v339_v1  ;;  %v263_v6 = vadd.f32 %v1016_v30, %v262_v3 }
 0x104   :  { %v717_v5 = vpop.f32.mrf.mxu0 }
 0x105   :  { %780 = vmatmul.mubr.bf16.gmra.mxu1 %v362_v4  ;;  %v341_v10 = vmax.f32 %v263_v6, 0.0 }
 0x106   :  { %v265_v7 = vpop.f32.mrf.mxu0  ;;  %783 = vmatprep.mubr.msk.bf16.mxu1 %vm851_vm0, %v850_v0 }
 0x107   :  { %v266_v8 = vadd.f32 %v1016_v30, %v265_v7 }
 0x108   :  { %v718_v9 = vpop.f32.mrf.mxu0 }
 0x109   :  { %v342_v11 = vmax.f32 %v266_v8, 0.0 }
 0x10a   :  { %v270_v12 = vpop.f32.mrf.mxu0 }
 0x10b   :  { %v363_v13 = vpack.c.bf16 %v342_v11, %v341_v10  ;;  %v271_v15 = vadd.f32 %v1016_v30, %v270_v12 }
 0x10c   :  { %v721_v14 = vpop.f32.mrf.mxu0 }
 0x10d   :  { %784 = vmatmul.mubr.bf16.gmra.mxu1 %v363_v13  ;;  %v343_v19 = vmax.f32 %v271_v15, 0.0 }
 0x10e   :  { %v273_v16 = vpop.f32.mrf.mxu0  ;;  %787 = vmatprep.mubr.msk.bf16.mxu1 %vm851_vm0, %v850_v0 }
 0x10f   :  { %v274_v17 = vadd.f32 %v1016_v30, %v273_v16 }
 0x110   :  { %v722_v18 = vpop.f32.mrf.mxu0 }
 0x111   :  { %v344_v20 = vmax.f32 %v274_v17, 0.0 }
 0x112   :  { %v278_v21 = vpop.f32.mrf.mxu0 }
 0x113   :  { %v364_v22 = vpack.c.bf16 %v344_v20, %v343_v19  ;;  %v279_v24 = vadd.f32 %v1016_v30, %v278_v21 }
 0x114   :  { %v725_v23 = vpop.f32.mrf.mxu0 }
 0x115   :  { %788 = vmatmul.mubr.bf16.gmra.mxu1 %v364_v22  ;;  %v345_v28 = vmax.f32 %v279_v24, 0.0  ;;  %v1071_v23 = vld [vmem:[%s1181_s4] ss:$0 sm:$0xff] }
 0x116   :  { %v281_v25 = vpop.f32.mrf.mxu0  ;;  %791 = vmatprep.mubr.msk.bf16.mxu1 %vm851_vm0, %v850_v0 }
 0x117   :  { %v282_v26 = vadd.f32 %v1016_v30, %v281_v25 }
 0x118   :  { %v726_v27 = vpop.f32.mrf.mxu0 }
 0x119   :  { %v346_v29 = vmax.f32 %v282_v26, 0.0 }
 0x11a   :  { %v286_v31 = vpop.f32.mrf.mxu0 }
 0x11b   :  { %v365_v32 = vpack.c.bf16 %v346_v29, %v345_v28  ;;  %v287_v34 = vadd.f32 %v1016_v30, %v286_v31 }
 0x11c   :  { %v729_v33 = vpop.f32.mrf.mxu0 }
 0x11d   :  { %792 = vmatmul.mubr.bf16.gmra.mxu1 %v365_v32  ;;  %v347_v38 = vmax.f32 %v287_v34, 0.0 }
 0x11e   :  { %v289_v35 = vpop.f32.mrf.mxu0  ;;  %795 = vmatprep.mubr.msk.bf16.mxu1 %vm851_vm0, %v850_v0 }
 0x11f   :  { %v290_v36 = vadd.f32 %v1016_v30, %v289_v35 }
 0x120   :  { %v730_v37 = vpop.f32.mrf.mxu0 }
 0x121   :  { %v348_v39 = vmax.f32 %v290_v36, 0.0 }
 0x122   :  { %v294_v40 = vpop.f32.mrf.mxu0 }
 0x123   :  { %v366_v41 = vpack.c.bf16 %v348_v39, %v347_v38  ;;  %v295_v43 = vadd.f32 %v1016_v30, %v294_v40 }
 0x124   :  { %v733_v42 = vpop.f32.mrf.mxu0 }
 0x125   :  { %796 = vmatmul.mubr.bf16.gmra.mxu1 %v366_v41  ;;  %v349_v47 = vmax.f32 %v295_v43, 0.0 }
 0x126   :  { %v297_v44 = vpop.f32.mrf.mxu0  ;;  %799 = vmatprep.mubr.msk.bf16.mxu1 %vm851_vm0, %v850_v0 }
 0x127   :  { %v298_v45 = vadd.f32 %v1016_v30, %v297_v44 }
 0x128   :  { %v734_v46 = vpop.f32.mrf.mxu0 }
 0x129   :  { %v350_v48 = vmax.f32 %v298_v45, 0.0 }
 0x12a   :  { %v302_v49 = vpop.f32.mrf.mxu0 }
 0x12b   :  { %v367_v50 = vpack.c.bf16 %v350_v48, %v349_v47  ;;  %v303_v52 = vadd.f32 %v1016_v30, %v302_v49 }
 0x12c   :  { %v737_v51 = vpop.f32.mrf.mxu0 }
 0x12d   :  { %800 = vmatmul.mubr.bf16.gmra.mxu1 %v367_v50  ;;  %v351_v56 = vmax.f32 %v303_v52, 0.0 }
 0x12e   :  { %v305_v53 = vpop.f32.mrf.mxu0  ;;  %803 = vmatprep.mubr.msk.bf16.mxu1 %vm851_vm0, %v850_v0 }
 0x12f   :  { %v306_v54 = vadd.f32 %v1016_v30, %v305_v53 }
 0x130   :  { %v738_v55 = vpop.f32.mrf.mxu0 }
 0x131   :  { %v352_v57 = vmax.f32 %v306_v54, 0.0 }
 0x132   :  { %v310_v58 = vpop.f32.mrf.mxu0 }
 0x133   :  { %v368_v59 = vpack.c.bf16 %v352_v57, %v351_v56  ;;  %v311_v61 = vadd.f32 %v1016_v30, %v310_v58 }
 0x134   :  { %v741_v60 = vpop.f32.mrf.mxu0 }
 0x135   :  { %804 = vmatmul.mubr.bf16.gmra.mxu1 %v368_v59  ;;  %v353_v2 = vmax.f32 %v311_v61, 0.0 }
 0x136   :  { %v313_v62 = vpop.f32.mrf.mxu0  ;;  %807 = vmatprep.mubr.msk.bf16.mxu1 %vm851_vm0, %v850_v0 }
 0x137   :  { %v314_v63 = vadd.f32 %v1016_v30, %v313_v62 }
 0x138   :  { %v742_v1 = vpop.f32.mrf.mxu0 }
 0x139   :  { %v354_v3 = vmax.f32 %v314_v63, 0.0 }
 0x13a   :  { %v318_v4 = vpop.f32.mrf.mxu0 }
 0x13b   :  { %v369_v5 = vpack.c.bf16 %v354_v3, %v353_v2  ;;  %v319_v7 = vadd.f32 %v1016_v30, %v318_v4 }
 0x13c   :  { %v745_v6 = vpop.f32.mrf.mxu0 }
 0x13d   :  { %808 = vmatmul.mubr.bf16.gmra.mxu1 %v369_v5  ;;  %v355_v11 = vmax.f32 %v319_v7, 0.0 }
 0x13e   :  { %v321_v8 = vpop.f32.mrf.mxu0  ;;  %811 = vmatprep.mubr.msk.bf16.mxu1 %vm851_vm0, %v850_v0 }
 0x13f   :  { %v322_v9 = vadd.f32 %v1016_v30, %v321_v8 }
 0x140   :  { %v746_v10 = vpop.f32.mrf.mxu0 }
 0x141   :  { %v356_v12 = vmax.f32 %v322_v9, 0.0 }
 0x142   :  { %v326_v13 = vpop.f32.mrf.mxu0 }
 0x143   :  { %v370_v14 = vpack.c.bf16 %v356_v12, %v355_v11  ;;  %v327_v16 = vadd.f32 %v1016_v30, %v326_v13 }
 0x144   :  { %v749_v15 = vpop.f32.mrf.mxu0 }
 0x145   :  { %812 = vmatmul.mubr.bf16.gmra.mxu1 %v370_v14  ;;  %v357_v20 = vmax.f32 %v327_v16, 0.0 }
 0x146   :  { %v329_v17 = vpop.f32.mrf.mxu0  ;;  %815 = vmatprep.mubr.msk.bf16.mxu1 %vm851_vm0, %v850_v0 }
 0x147   :  { %v330_v18 = vadd.f32 %v1016_v30, %v329_v17 }
 0x148   :  { %v750_v19 = vpop.f32.mrf.mxu0 }
 0x149   :  { %v358_v21 = vmax.f32 %v330_v18, 0.0 }
 0x14b   :  { %v371_v22 = vpack.c.bf16 %v358_v21, %v357_v20 }
 0x14d   :  { %816 = vmatmul.mubr.bf16.gmra.mxu1 %v371_v22 }
 0x1ad   :  { %v477_v24 = vpop.f32.mrf.mxu1 }
 0x1ae   :  { %v478_v25 = vadd.f32 %v1071_v23, %v477_v24 }
 0x1af   :  { %v769_v26 = vpop.f32.mrf.mxu1 }
 0x1b0   :  { %580 = vst [vmem:[%s1182_s5] sm:$0xff] %v478_v25 }
 0x1b1   :  { %v480_v0 = vpop.f32.mrf.mxu1 }
 0x1b2   :  { %v481_v30 = vadd.f32 %v1071_v23, %v480_v0 }
 0x1b3   :  { %v770_v27 = vpop.f32.mrf.mxu1 }
 0x1b4   :  { %581 = vst [vmem:[%s1182_s5 + $0x8] sm:$0xff] %v481_v30 }
 0x1b5   :  { %v485_v28 = vpop.f32.mrf.mxu1 }
 0x1b6   :  { %v486_v29 = vadd.f32 %v1071_v23, %v485_v28 }
 0x1b7   :  { %v773_v31 = vpop.f32.mrf.mxu1 }
 0x1b8   :  { %582 = vst [vmem:[%s1182_s5 + $0x10] sm:$0xff] %v486_v29 }
 0x1b9   :  { %v488_v32 = vpop.f32.mrf.mxu1 }
 0x1ba   :  { %v489_v33 = vadd.f32 %v1071_v23, %v488_v32 }
 0x1bb   :  { %v774_v34 = vpop.f32.mrf.mxu1 }
 0x1bc   :  { %583 = vst [vmem:[%s1182_s5 + $0x18] sm:$0xff] %v489_v33 }
 0x1bd   :  { %v493_v35 = vpop.f32.mrf.mxu1 }
 0x1be   :  { %v494_v36 = vadd.f32 %v1071_v23, %v493_v35 }
 0x1bf   :  { %v777_v37 = vpop.f32.mrf.mxu1 }
 0x1c0   :  { %584 = vst [vmem:[%s1182_s5 + $0x20] sm:$0xff] %v494_v36 }
 0x1c1   :  { %v496_v38 = vpop.f32.mrf.mxu1 }
 0x1c2   :  { %v497_v39 = vadd.f32 %v1071_v23, %v496_v38 }
 0x1c3   :  { %v778_v40 = vpop.f32.mrf.mxu1 }
 0x1c4   :  { %585 = vst [vmem:[%s1182_s5 + $0x28] sm:$0xff] %v497_v39 }
 0x1c5   :  { %v501_v41 = vpop.f32.mrf.mxu1 }
 0x1c6   :  { %v502_v42 = vadd.f32 %v1071_v23, %v501_v41 }
 0x1c7   :  { %v781_v43 = vpop.f32.mrf.mxu1 }
 0x1c8   :  { %586 = vst [vmem:[%s1182_s5 + $0x30] sm:$0xff] %v502_v42 }
 0x1c9   :  { %v504_v44 = vpop.f32.mrf.mxu1 }
 0x1ca   :  { %v505_v45 = vadd.f32 %v1071_v23, %v504_v44 }
 0x1cb   :  { %v782_v46 = vpop.f32.mrf.mxu1 }
 0x1cc   :  { %587 = vst [vmem:[%s1182_s5 + $0x38] sm:$0xff] %v505_v45 }
 0x1cd   :  { %v509_v47 = vpop.f32.mrf.mxu1 }
 0x1ce   :  { %v510_v48 = vadd.f32 %v1071_v23, %v509_v47 }
 0x1cf   :  { %v785_v49 = vpop.f32.mrf.mxu1 }
 0x1d0   :  { %588 = vst [vmem:[%s1182_s5 + $0x40] sm:$0xff] %v510_v48 }
 0x1d1   :  { %v512_v50 = vpop.f32.mrf.mxu1 }
 0x1d2   :  { %v513_v51 = vadd.f32 %v1071_v23, %v512_v50 }
 0x1d3   :  { %v786_v52 = vpop.f32.mrf.mxu1 }
 0x1d4   :  { %589 = vst [vmem:[%s1182_s5 + $0x48] sm:$0xff] %v513_v51 }
 0x1d5   :  { %v517_v53 = vpop.f32.mrf.mxu1 }
 0x1d6   :  { %v518_v54 = vadd.f32 %v1071_v23, %v517_v53 }
 0x1d7   :  { %v789_v55 = vpop.f32.mrf.mxu1 }
 0x1d8   :  { %590 = vst [vmem:[%s1182_s5 + $0x50] sm:$0xff] %v518_v54 }
 0x1d9   :  { %v520_v56 = vpop.f32.mrf.mxu1 }
 0x1da   :  { %v521_v57 = vadd.f32 %v1071_v23, %v520_v56 }
 0x1db   :  { %v790_v58 = vpop.f32.mrf.mxu1 }
 0x1dc   :  { %591 = vst [vmem:[%s1182_s5 + $0x58] sm:$0xff] %v521_v57 }
 0x1dd   :  { %v525_v59 = vpop.f32.mrf.mxu1 }
 0x1de   :  { %v526_v60 = vadd.f32 %v1071_v23, %v525_v59 }
 0x1df   :  { %v793_v61 = vpop.f32.mrf.mxu1 }
 0x1e0   :  { %592 = vst [vmem:[%s1182_s5 + $0x60] sm:$0xff] %v526_v60 }
 0x1e1   :  { %v528_v62 = vpop.f32.mrf.mxu1 }
 0x1e2   :  { %v529_v63 = vadd.f32 %v1071_v23, %v528_v62 }
 0x1e3   :  { %v794_v1 = vpop.f32.mrf.mxu1 }
 0x1e4   :  { %593 = vst [vmem:[%s1182_s5 + $0x68] sm:$0xff] %v529_v63 }
 0x1e5   :  { %v533_v2 = vpop.f32.mrf.mxu1 }
 0x1e6   :  { %v534_v3 = vadd.f32 %v1071_v23, %v533_v2 }
 0x1e7   :  { %v797_v4 = vpop.f32.mrf.mxu1 }
 0x1e8   :  { %594 = vst [vmem:[%s1182_s5 + $0x70] sm:$0xff] %v534_v3 }
 0x1e9   :  { %v536_v5 = vpop.f32.mrf.mxu1 }
 0x1ea   :  { %v537_v6 = vadd.f32 %v1071_v23, %v536_v5 }
 0x1eb   :  { %v798_v7 = vpop.f32.mrf.mxu1 }
 0x1ec   :  { %595 = vst [vmem:[%s1182_s5 + $0x78] sm:$0xff] %v537_v6 }
 0x1ed   :  { %v541_v8 = vpop.f32.mrf.mxu1 }
 0x1ee   :  { %v542_v9 = vadd.f32 %v1071_v23, %v541_v8 }
 0x1ef   :  { %v801_v10 = vpop.f32.mrf.mxu1 }
 0x1f0   :  { %596 = vst [vmem:[%s1182_s5 + $0x80] sm:$0xff] %v542_v9 }
 0x1f1   :  { %v544_v11 = vpop.f32.mrf.mxu1 }
 0x1f2   :  { %v545_v12 = vadd.f32 %v1071_v23, %v544_v11 }
 0x1f3   :  { %v802_v13 = vpop.f32.mrf.mxu1 }
 0x1f4   :  { %597 = vst [vmem:[%s1182_s5 + $0x88] sm:$0xff] %v545_v12 }
 0x1f5   :  { %v549_v14 = vpop.f32.mrf.mxu1 }
 0x1f6   :  { %v550_v15 = vadd.f32 %v1071_v23, %v549_v14 }
 0x1f7   :  { %v805_v16 = vpop.f32.mrf.mxu1 }
 0x1f8   :  { %598 = vst [vmem:[%s1182_s5 + $0x90] sm:$0xff] %v550_v15 }
 0x1f9   :  { %v552_v17 = vpop.f32.mrf.mxu1 }
 0x1fa   :  { %v553_v18 = vadd.f32 %v1071_v23, %v552_v17 }
 0x1fb   :  { %v806_v19 = vpop.f32.mrf.mxu1 }
 0x1fc   :  { %599 = vst [vmem:[%s1182_s5 + $0x98] sm:$0xff] %v553_v18 }
 0x1fd   :  { %v557_v20 = vpop.f32.mrf.mxu1 }
 0x1fe   :  { %v558_v21 = vadd.f32 %v1071_v23, %v557_v20 }
 0x1ff   :  { %v809_v22 = vpop.f32.mrf.mxu1 }
 0x200   :  { %600 = vst [vmem:[%s1182_s5 + $0xa0] sm:$0xff] %v558_v21 }
 0x201   :  { %v560_v24 = vpop.f32.mrf.mxu1 }
 0x202   :  { %v561_v25 = vadd.f32 %v1071_v23, %v560_v24 }
 0x203   :  { %v810_v26 = vpop.f32.mrf.mxu1 }
 0x204   :  { %601 = vst [vmem:[%s1182_s5 + $0xa8] sm:$0xff] %v561_v25 }
 0x205   :  { %v565_v0 = vpop.f32.mrf.mxu1 }
 0x206   :  { %v566_v30 = vadd.f32 %v1071_v23, %v565_v0 }
 0x207   :  { %v813_v27 = vpop.f32.mrf.mxu1 }
 0x208   :  { %602 = vst [vmem:[%s1182_s5 + $0xb0] sm:$0xff] %v566_v30 }
 0x209   :  { %v568_v28 = vpop.f32.mrf.mxu1 }
 0x20a   :  { %v569_v29 = vadd.f32 %v1071_v23, %v568_v28 }
 0x20b   :  { %v814_v31 = vpop.f32.mrf.mxu1 }
 0x20c   :  { %603 = vst [vmem:[%s1182_s5 + $0xb8] sm:$0xff] %v569_v29 }
 0x20d   :  { %v573_v32 = vpop.f32.mrf.mxu1 }
 0x20e   :  { %v574_v33 = vadd.f32 %v1071_v23, %v573_v32 }
 0x20f   :  { %v817_v34 = vpop.f32.mrf.mxu1 }
 0x210   :  { %604 = vst [vmem:[%s1182_s5 + $0xc0] sm:$0xff] %v574_v33 }
 0x211   :  { %v576_v35 = vpop.f32.mrf.mxu1 }
 0x212   :  { %v577_v36 = vadd.f32 %v1071_v23, %v576_v35 }
 0x213   :  { %v818_v37 = vpop.f32.mrf.mxu1 }
 0x214   :  { %605 = vst [vmem:[%s1182_s5 + $0xc8] sm:$0xff] %v577_v36 }

</bundles_post_ra>
